<compile_context>
chip_gen: v5e
topology: v5e:2x2
jax: 0.10.0
libtpu: 0.0.40
codegen_flags: <defaults>
</compile_context>

<pallas_src>
import math
import jax
import jax.numpy as jnp
from jax.experimental import pallas as pl
from jax.experimental.pallas import tpu as pltpu


INPUT_DIM = 15
HIDDEN = 256
TB_MAX = 4096    # batch-tile cap: ~8 MiB double-buffered (x + bf16 out tiles) + ~0.3 MiB weights


def mlp_kernel(x_ref, w1_ref, b1_ref, w2_ref, b2_ref, o_ref):
    # Layer 1: (tb, 15) f32 @ (15, 256) f32 -> f32 acc, + bias, ReLU.
    h = jnp.dot(x_ref[...], w1_ref[...], preferred_element_type=jnp.float32)
    h = jnp.maximum(h + b1_ref[...], 0.0)
    # Layer 2: (tb, 256) f32 @ (256, 256) f32 -> f32 acc, + bias, ReLU.
    # h stays in vregs (no HBM round-trip between layers); final store casts to
    # o_ref's dtype (bf16 by default) to halve the output writeback bytes.
    o = jnp.dot(h, w2_ref[...], preferred_element_type=jnp.float32)
    o_ref[...] = jnp.maximum(o + b2_ref[...], 0.0).astype(o_ref.dtype)


def _round_up(x, m):
    return (x + m - 1) // m * m


def _choose_batch_tile(B):
    """Near-equal 16-aligned batch tiles bounded by TB_MAX.

    Tiny batches collapse to a single tile (no per-step grid overhead); anything
    larger gets >=2 grid steps so v7x's second TensorCore shares the batch axis.
    """
    if B <= 256:
        tb = max(16, _round_up(B, 16))
        return tb, tb
    n_tiles = max(2, pl.cdiv(B, TB_MAX))
    tb = min(TB_MAX, _round_up(pl.cdiv(B, n_tiles), 16))
    n_tiles = pl.cdiv(B, tb)
    return tb, n_tiles * tb


def mlp_forward(s, params, out_dtype=jnp.bfloat16):
    """Mirrors mlp.forward: flatten from dim 1, run the fused 2-layer MLP.

    Returns (logits, state) with state=None, like the PyTorch module.
    out_dtype=jnp.float32 is available for strict fp32-output parity at ~1.8x
    more HBM writeback; bf16 is the default per the perf review.
    """
    w1, b1, w2, b2 = params
    x = jnp.asarray(s, jnp.float32)
    x = x.reshape(x.shape[0], -1)                   # s.flatten(1)
    B, d_in = x.shape
    h2 = w2.shape[1]

    tb, b_pad = _choose_batch_tile(B)
    if b_pad != B:
        x = jnp.pad(x, ((0, b_pad - B), (0, 0)))    # only the (small) batch tail

    logits = pl.pallas_call(
        mlp_kernel,
        out_shape=jax.ShapeDtypeStruct((b_pad, h2), out_dtype),
        grid=(b_pad // tb,),
        in_specs=[
            pl.BlockSpec((tb, d_in), lambda i: (i, 0)),        # x streams per tile
            pl.BlockSpec((d_in, HIDDEN), lambda i: (0, 0)),    # W1 resident in VMEM
            pl.BlockSpec((1, HIDDEN), lambda i: (0, 0)),       # b1 resident
            pl.BlockSpec((HIDDEN, HIDDEN), lambda i: (0, 0)),  # W2 resident
            pl.BlockSpec((1, HIDDEN), lambda i: (0, 0)),       # b2 resident
        ],
        out_specs=pl.BlockSpec((tb, h2), lambda i: (i, 0)),
        compiler_params=pltpu.CompilerParams(
            dimension_semantics=("parallel",),                 # use both TCs on v7x
            vmem_limit_bytes=32 * 1024 * 1024),
    )(x, w1, b1, w2, b2)
    return logits[:B], None


def init_params(key):
    """Deterministic init matching nn.Linear default: U(-1/sqrt(in), 1/sqrt(in))."""
    layer_sizes = (INPUT_DIM, HIDDEN, HIDDEN)
    params = []
    for in_dim, out_dim in zip(layer_sizes[:-1], layer_sizes[1:]):
        key, kw, kb = jax.random.split(key, 3)
        bound = 1.0 / math.sqrt(in_dim)
        w = jax.random.uniform(kw, (in_dim, out_dim), jnp.float32, -bound, bound)
        b = jax.random.uniform(kb, (1, out_dim), jnp.float32, -bound, bound)
        params += [w, b]
    return tuple(params)


if __name__ == "__main__":
    key = jax.random.PRNGKey(0)
    key, k_in = jax.random.split(key)
    params = init_params(key)

    # Small input consistent with forward(): flatten(1) maps (batch, 3, 5) -> (batch, 15).
    batch = 8
    s = jax.random.normal(k_in, (batch, 3, 5), dtype=jnp.float32)

    logits, state = mlp_forward(s, params)
    jax.block_until_ready(logits)

    # Pure-f32 reference (fp32 torch semantics); kernel output only differs by the
    # final bf16 rounding of the store (plus MXU f32-matmul rounding), so a loose
    # tolerance vs the f32 reference suffices.
    x = s.reshape(batch, -1)
    w1, b1, w2, b2 = params
    h = jnp.maximum(jnp.dot(x, w1, precision=jax.lax.Precision.HIGHEST) + b1, 0.0)
    ref = jnp.maximum(jnp.dot(h, w2, precision=jax.lax.Precision.HIGHEST) + b2, 0.0)

    assert logits.shape == (batch, HIDDEN)
    assert logits.dtype == jnp.bfloat16
    assert state is None
    err = float(jnp.max(jnp.abs(logits.astype(jnp.float32) - ref)))
    assert jnp.allclose(logits.astype(jnp.float32), ref, atol=5e-2, rtol=5e-2), err
    print("KERNEL_OK")
</pallas_src>

<mosaic_0001>
module attributes {stable_mosaic.version = 11 : i64} {
  func.func @mlp_kernel(%arg0: i32, %arg1: memref<16x15xf32, #tpu.memory_space<vmem>>, %arg2: memref<15x256xf32, #tpu.memory_space<vmem>>, %arg3: memref<1x256xf32, #tpu.memory_space<vmem>>, %arg4: memref<256x256xf32, #tpu.memory_space<vmem>>, %arg5: memref<1x256xf32, #tpu.memory_space<vmem>>, %arg6: memref<16x256xbf16, #tpu.memory_space<vmem>>) attributes {dimension_semantics = [#tpu.dimension_semantics<parallel>], iteration_bounds = array<i64: 1>, scalar_prefetch = 0 : i64, scratch_operands = 0 : i64, tpu.core_type = #tpu.core_type<tc>, window_params = [{transform_indices = @transform_0, window_bounds = array<i64: 16, 15>}, {pipeline_mode = #tpu.pipeline_mode<synchronous>, transform_indices = @transform_1, window_bounds = array<i64: 15, 256>}, {pipeline_mode = #tpu.pipeline_mode<synchronous>, transform_indices = @transform_2, window_bounds = array<i64: 1, 256>}, {pipeline_mode = #tpu.pipeline_mode<synchronous>, transform_indices = @transform_3, window_bounds = array<i64: 256, 256>}, {pipeline_mode = #tpu.pipeline_mode<synchronous>, transform_indices = @transform_4, window_bounds = array<i64: 1, 256>}, {transform_indices = @transform_5, window_bounds = array<i64: 16, 256>}]} {
    %c0 = arith.constant 0 : index
    %c0_0 = arith.constant 0 : index
    %0 = vector.load %arg1[%c0, %c0_0] : memref<16x15xf32, #tpu.memory_space<vmem>>, vector<16x15xf32>
    %c0_1 = arith.constant 0 : index
    %c0_2 = arith.constant 0 : index
    %1 = vector.load %arg2[%c0_1, %c0_2] : memref<15x256xf32, #tpu.memory_space<vmem>>, vector<15x256xf32>
    %cst = arith.constant dense<0.000000e+00> : vector<16x256xf32>
    %2 = tpu.matmul %0, %1, %cst {dimension_numbers = #tpu.dot_dimension_numbers<[1], [0], [0], [1], [0, 0, 1, 1], [], []>} : vector<16x15xf32>, vector<15x256xf32>, vector<16x256xf32> -> vector<16x256xf32>
    %c0_3 = arith.constant 0 : index
    %c0_4 = arith.constant 0 : index
    %3 = vector.load %arg3[%c0_3, %c0_4] : memref<1x256xf32, #tpu.memory_space<vmem>>, vector<1x256xf32>
    %4 = vector.broadcast %3 : vector<1x256xf32> to vector<16x256xf32>
    %5 = arith.addf %2, %4 : vector<16x256xf32>
    %cst_5 = arith.constant 0.000000e+00 : f32
    %6 = vector.broadcast %cst_5 : f32 to vector<16x256xf32>
    %7 = arith.maximumf %5, %6 : vector<16x256xf32>
    %c0_6 = arith.constant 0 : index
    %c0_7 = arith.constant 0 : index
    %8 = vector.load %arg4[%c0_6, %c0_7] : memref<256x256xf32, #tpu.memory_space<vmem>>, vector<256x256xf32>
    %cst_8 = arith.constant dense<0.000000e+00> : vector<16x256xf32>
    %9 = tpu.matmul %7, %8, %cst_8 {dimension_numbers = #tpu.dot_dimension_numbers<[1], [0], [0], [1], [0, 0, 1, 1], [], []>} : vector<16x256xf32>, vector<256x256xf32>, vector<16x256xf32> -> vector<16x256xf32>
    %c0_9 = arith.constant 0 : index
    %c0_10 = arith.constant 0 : index
    %10 = vector.load %arg5[%c0_9, %c0_10] : memref<1x256xf32, #tpu.memory_space<vmem>>, vector<1x256xf32>
    %11 = vector.broadcast %10 : vector<1x256xf32> to vector<16x256xf32>
    %12 = arith.addf %9, %11 : vector<16x256xf32>
    %cst_11 = arith.constant 0.000000e+00 : f32
    %13 = vector.broadcast %cst_11 : f32 to vector<16x256xf32>
    %14 = arith.maximumf %12, %13 : vector<16x256xf32>
    %15 = arith.truncf %14 : vector<16x256xf32> to vector<16x256xbf16>
    %c0_12 = arith.constant 0 : index
    %c0_13 = arith.constant 0 : index
    %16 = vector.load %arg6[%c0_12, %c0_13] : memref<16x256xbf16, #tpu.memory_space<vmem>>, vector<16x256xbf16>
    tpu.vector_store %arg6[%c0_12, %c0_13], %15 {strides = array<i32>} : memref<16x256xbf16, #tpu.memory_space<vmem>>, vector<16x256xbf16>,
    return
  }
  func.func @transform_0(%arg0: i32) -> (i32, i32) {
    %c0_i32 = arith.constant 0 : i32
    %c0_i32_0 = arith.constant 0 : i32
    return %arg0, %c0_i32 : i32, i32
  }
  func.func @transform_1(%arg0: i32) -> (i32, i32) {
    %c0_i32 = arith.constant 0 : i32
    %c0_i32_0 = arith.constant 0 : i32
    %c0_i32_1 = arith.constant 0 : i32
    return %c0_i32, %c0_i32_0 : i32, i32
  }
  func.func @transform_2(%arg0: i32) -> (i32, i32) {
    %c0_i32 = arith.constant 0 : i32
    %c0_i32_0 = arith.constant 0 : i32
    %c0_i32_1 = arith.constant 0 : i32
    return %c0_i32, %c0_i32_0 : i32, i32
  }
  func.func @transform_3(%arg0: i32) -> (i32, i32) {
    %c0_i32 = arith.constant 0 : i32
    %c0_i32_0 = arith.constant 0 : i32
    %c0_i32_1 = arith.constant 0 : i32
    return %c0_i32, %c0_i32_0 : i32, i32
  }
  func.func @transform_4(%arg0: i32) -> (i32, i32) {
    %c0_i32 = arith.constant 0 : i32
    %c0_i32_0 = arith.constant 0 : i32
    %c0_i32_1 = arith.constant 0 : i32
    return %c0_i32, %c0_i32_0 : i32, i32
  }
  func.func @transform_5(%arg0: i32) -> (i32, i32) {
    %c0_i32 = arith.constant 0 : i32
    %c0_i32_0 = arith.constant 0 : i32
    return %arg0, %c0_i32 : i32, i32
  }
}

</mosaic_0001>

<bundles_post_ra>
// kernel: tpu_custom_call.1
= control target key start
LH: loop header
LB: loop body
LE: loop exit
PB: predicated region body
PF: predicated region fallthrough
CT: control target
= control target key end

     0   :  { %10 = vsyncpa [#allocation3], 0  ;;  %s559_s0 = inlined_call_operand.hbm [shape: f32[16,15], index: 0, kind: input, shape index: {}]   ;;  %s560_s1 = inlined_call_operand.hbm [shape: f32[15,256], index: 1, kind: input, shape index: {}]   ;;  %s561_s2 = inlined_call_operand.hbm [shape: f32[1,256], index: 2, kind: input, shape index: {}]   ;;  %s562_s3 = inlined_call_operand.hbm [shape: f32[256,256], index: 3, kind: input, shape index: {}]   ;;  %s563_s4 = inlined_call_operand.vmem [shape: f32[1,256], index: 4, kind: input, shape index: {}]   ;;  %s564_s5 = inlined_call_operand.hbm [shape: bf16[16,256], index: 5, kind: output, shape index: {}]  }
   0x1   :  { %11 = vsyncpa [#allocation6], 0 }
   0x2   :  { %12 = vsyncpa [#allocation9], 0  ;;  %s31_s20 = sshll.u32 %s560_s1, 4  ;;  %s32_s20 = int_to_ptr.hbm [resolvable:$true] %s31_s20 }
   0x3   :  { %13 = vsyncpa [#allocation4], 0  ;;  %s492_s21 = smov [#allocation5]   ;;  %s18_s25 = sshll.u32 %s559_s0, 4  ;;  %s19_s25 = int_to_ptr.hbm [resolvable:$true] %s18_s25 }
   0x4   :  { %s33_s22 = sshll.u32 %s492_s21, 4  ;;  %s493_s26 = smov 256   ;;  %s34_s22 = int_to_ptr.vmem [resolvable:$true] %s33_s22 }
   0x5   :  { %s494_s27 = smov 16   ;;  %s495_s28 = smov [#allocation2]  }
   0x6   :  { %39 = dma.hbm_to_vmem [thread:$0]  %s32_s20, 512, %s34_s22, [#allocation6], %s493_s26, %s493_s26, %s494_s27  }
   0x7   :  { %s20_s29 = sshll.u32 %s495_s28, 4  ;;  %s496_s30 = smov 128   ;;  %s21_s29 = int_to_ptr.vmem [resolvable:$true] %s20_s29 }
   0x8   :  { %s497_s6 = smov 8   ;;  %s45_s8 = sshll.u32 %s561_s2, 4  ;;  %s46_s8 = int_to_ptr.hbm [resolvable:$true] %s45_s8 }
   0x9   :  { %26 = dma.hbm_to_vmem [thread:$0]  %s19_s25, 256, %s21_s29, [#allocation3], %s496_s30, %s496_s30, %s497_s6  }
   0xa   :  { %s498_s9 = smov [#allocation7]   ;;  %s55_s12 = sshll.u32 %s562_s3, 4  ;;  %s56_s12 = int_to_ptr.hbm [resolvable:$true] %s55_s12 }
   0xb   :  { %s47_s0 = sshll.u32 %s498_s9, 4  ;;  %s499_s13 = smov [#allocation8]   ;;  %s48_s0 = int_to_ptr.vmem [resolvable:$true] %s47_s0 }
   0xc   :  { %50 = dma.hbm_to_vmem [thread:$0]  %s46_s8, 32, %s48_s0, [#allocation6]  }
   0xd   :  { %s57_s14 = sshll.u32 %s499_s13, 4  ;;  %s58_s14 = int_to_ptr.vmem [resolvable:$true] %s57_s14 }
   0xe   :  { %63 = dma.hbm_to_vmem [thread:$0]  %s56_s12, 8192, %s58_s14, [#allocation9], %s493_s26, %s493_s26, %s494_s27  }
   0xf   :  { %484 = dma.done.wait [#allocation3], 256  }
  0x10   :  { %485 = vsyncadd [#allocation3], 4294967040 }
  0x11   :  { %486 = dma.done.wait [#allocation6], 544  }
  0x12   :  { %487 = vsyncadd [#allocation6], 4294966752 }
  0x13   :  { %488 = dma.done.wait [#allocation9], 8192  }
  0x14   :  { %489 = vsyncadd [#allocation9], 4294959104  ;;  %vm101_vm0 = vcmask 1046528   ;;  %v86_v0 = vld [vmem:[#allocation5 + $0x10] sm:$0x7f]  ;;  %v84_v1 = vld [vmem:[#allocation5] sm:$0xff] }
  0x15   :  { %v87_v2 = vld [vmem:[#allocation5 + $0x18] sm:$0x7f]  ;;  %349 = vmatpush.msk.msra.mxu0 %vm101_vm0, %v86_v0  ;;  %v82_v3 = vld [vmem:[#allocation2] sm:$0xff]  ;;  %vm94_vm1 = vcmask 121856   ;;  %v85_v4 = vld [vmem:[#allocation5 + $0x8] sm:$0xff]  ;;  %s334_s18 = sshll.u32 %s564_s5, 4  ;;  %s335_s18 = int_to_ptr.hbm [resolvable:$true] %s334_s18 }
  0x16   :  { %352 = vmatpush.msk.msra.mxu1 %vm101_vm0, %v87_v2  ;;  %v188_v5 = vld [vmem:[#allocation8 + $0xf0] sm:$0xff]  ;;  %v189_v6 = vld [vmem:[#allocation8 + $0xf8] sm:$0xff]  ;;  %v186_v9 = vld [vmem:[#allocation8 + $0xe0] sm:$0xff] }
  0x17   :  { %123 = vmatpush.msra.mxu0 %v84_v1  ;;  %v220_v7 = vld [vmem:[#allocation8 + $0x1f0] sm:$0xff]  ;;  %v221_v8 = vld [vmem:[#allocation8 + $0x1f8] sm:$0xff]  ;;  %v187_v10 = vld [vmem:[#allocation8 + $0xe8] sm:$0xff]  ;;  %228 = vmatpush.msra.mxu2 %v188_v5 }
  0x18   :  { %146 = vmatpush.msra.mxu1 %v85_v4  ;;  %350 = vmatmul.msk.f32.vlgmr.msra.gmra.mxu0 %vm94_vm1, %v82_v3  ;;  %v218_v11 = vld [vmem:[#allocation8 + $0x1e0] sm:$0xff]  ;;  %v219_v12 = vld [vmem:[#allocation8 + $0x1e8] sm:$0xff]  ;;  %v184_v13 = vld [vmem:[#allocation8 + $0xd0] sm:$0xff] }
  0x19   :  { %353 = vmatmul.msk.f32.vlgmr.msra.gmra.mxu1 %vm94_vm1, %v82_v3  ;;  %274 = vmatpush.msrb.mxu0 %v189_v6  ;;  %v185_v14 = vld [vmem:[#allocation8 + $0xd8] sm:$0xff]  ;;  %v216_v15 = vld [vmem:[#allocation8 + $0x1d0] sm:$0xff]  ;;  %v182_v17 = vld [vmem:[#allocation8 + $0xc0] sm:$0xff] }
  0x1a   :  { %251 = vmatpush.msra.mxu3 %v220_v7  ;;  %297 = vmatpush.msrb.mxu1 %v221_v8  ;;  %v217_v16 = vld [vmem:[#allocation8 + $0x1d8] sm:$0xff]  ;;  %v183_v18 = vld [vmem:[#allocation8 + $0xc8] sm:$0xff]  ;;  %v180_v20 = vld [vmem:[#allocation8 + $0xb0] sm:$0xff] }
  0x1b   :  { %229 = vmatpush.msra.mxu2 %v186_v9  ;;  %275 = vmatpush.msrb.mxu0 %v187_v10  ;;  %v83_v19 = vld [vmem:[#allocation2 + $0x8] sm:$0xff]  ;;  %v214_v21 = vld [vmem:[#allocation8 + $0x1c0] sm:$0xff]  ;;  %v215_v23 = vld [vmem:[#allocation8 + $0x1c8] sm:$0xff] }
  0x1c   :  { %252 = vmatpush.msra.mxu3 %v218_v11  ;;  %298 = vmatpush.msrb.mxu1 %v219_v12  ;;  %v181_v22 = vld [vmem:[#allocation8 + $0xb8] sm:$0xff]  ;;  %v178_v24 = vld [vmem:[#allocation8 + $0xa0] sm:$0xff]  ;;  %v212_v25 = vld [vmem:[#allocation8 + $0x1b0] sm:$0xff] }
  0x1d   :  { %230 = vmatpush.msra.mxu2 %v184_v13  ;;  %276 = vmatpush.msrb.mxu0 %v185_v14  ;;  %v179_v26 = vld [vmem:[#allocation8 + $0xa8] sm:$0xff]  ;;  %v213_v27 = vld [vmem:[#allocation8 + $0x1b8] sm:$0xff]  ;;  %v176_v28 = vld [vmem:[#allocation8 + $0x90] sm:$0xff] }
  0x1e   :  { %253 = vmatpush.msra.mxu3 %v216_v15  ;;  %299 = vmatpush.msrb.mxu1 %v217_v16  ;;  %v210_v29 = vld [vmem:[#allocation8 + $0x1a0] sm:$0xff]  ;;  %v177_v30 = vld [vmem:[#allocation8 + $0x98] sm:$0xff]  ;;  %v211_v31 = vld [vmem:[#allocation8 + $0x1a8] sm:$0xff] }
  0x1f   :  { %231 = vmatpush.msra.mxu2 %v182_v17  ;;  %277 = vmatpush.msrb.mxu0 %v183_v18  ;;  %v174_v32 = vld [vmem:[#allocation8 + $0x80] sm:$0xff]  ;;  %v208_v33 = vld [vmem:[#allocation8 + $0x190] sm:$0xff]  ;;  %v175_v34 = vld [vmem:[#allocation8 + $0x88] sm:$0xff] }
  0x20   :  { %351 = vmatmul.msk.f32.gmra.mxu0 %vm94_vm1, %v83_v19  ;;  %254 = vmatpush.msra.mxu3 %v214_v21  ;;  %v209_v35 = vld [vmem:[#allocation8 + $0x198] sm:$0xff]  ;;  %v172_v36 = vld [vmem:[#allocation8 + $0x70] sm:$0xff]  ;;  %v206_v37 = vld [vmem:[#allocation8 + $0x180] sm:$0xff] }
  0x21   :  { %354 = vmatmul.msk.f32.gmra.mxu1 %vm94_vm1, %v83_v19  ;;  %232 = vmatpush.msra.mxu2 %v180_v20  ;;  %v173_v38 = vld [vmem:[#allocation8 + $0x78] sm:$0xff]  ;;  %v207_v39 = vld [vmem:[#allocation8 + $0x188] sm:$0xff]  ;;  %v170_v40 = vld [vmem:[#allocation8 + $0x60] sm:$0xff] }
  0x22   :  { %278 = vmatpush.msrb.mxu0 %v181_v22  ;;  %300 = vmatpush.msrb.mxu1 %v215_v23  ;;  %v204_v41 = vld [vmem:[#allocation8 + $0x170] sm:$0xff]  ;;  %v171_v42 = vld [vmem:[#allocation8 + $0x68] sm:$0xff]  ;;  %v205_v43 = vld [vmem:[#allocation8 + $0x178] sm:$0xff] }
  0x23   :  { %233 = vmatpush.msra.mxu2 %v178_v24  ;;  %255 = vmatpush.msra.mxu3 %v212_v25  ;;  %v168_v44 = vld [vmem:[#allocation8 + $0x50] sm:$0xff]  ;;  %v202_v45 = vld [vmem:[#allocation8 + $0x160] sm:$0xff]  ;;  %v169_v46 = vld [vmem:[#allocation8 + $0x58] sm:$0xff] }
  0x24   :  { %279 = vmatpush.msrb.mxu0 %v179_v26  ;;  %301 = vmatpush.msrb.mxu1 %v213_v27  ;;  %v203_v47 = vld [vmem:[#allocation8 + $0x168] sm:$0xff]  ;;  %v166_v48 = vld [vmem:[#allocation8 + $0x40] sm:$0xff]  ;;  %v200_v49 = vld [vmem:[#allocation8 + $0x150] sm:$0xff] }
  0x25   :  { %234 = vmatpush.msra.mxu2 %v176_v28  ;;  %256 = vmatpush.msra.mxu3 %v210_v29  ;;  %v167_v50 = vld [vmem:[#allocation8 + $0x48] sm:$0xff]  ;;  %v201_v51 = vld [vmem:[#allocation8 + $0x158] sm:$0xff]  ;;  %v164_v52 = vld [vmem:[#allocation8 + $0x30] sm:$0xff] }
  0x26   :  { %280 = vmatpush.msrb.mxu0 %v177_v30  ;;  %302 = vmatpush.msrb.mxu1 %v211_v31  ;;  %v198_v53 = vld [vmem:[#allocation8 + $0x140] sm:$0xff]  ;;  %v165_v54 = vld [vmem:[#allocation8 + $0x38] sm:$0xff]  ;;  %v199_v55 = vld [vmem:[#allocation8 + $0x148] sm:$0xff] }
  0x27   :  { %235 = vmatpush.msra.mxu2 %v174_v32  ;;  %257 = vmatpush.msra.mxu3 %v208_v33  ;;  %v162_v56 = vld [vmem:[#allocation8 + $0x20] sm:$0xff]  ;;  %v196_v57 = vld [vmem:[#allocation8 + $0x130] sm:$0xff]  ;;  %v163_v58 = vld [vmem:[#allocation8 + $0x28] sm:$0xff] }
  0x28   :  { %281 = vmatpush.msrb.mxu0 %v175_v34  ;;  %303 = vmatpush.msrb.mxu1 %v209_v35  ;;  %v197_v59 = vld [vmem:[#allocation8 + $0x138] sm:$0xff]  ;;  %v160_v60 = vld [vmem:[#allocation8 + $0x10] sm:$0xff]  ;;  %v194_v61 = vld [vmem:[#allocation8 + $0x120] sm:$0xff] }
  0x29   :  { %236 = vmatpush.msra.mxu2 %v172_v36  ;;  %258 = vmatpush.msra.mxu3 %v206_v37  ;;  %v161_v62 = vld [vmem:[#allocation8 + $0x18] sm:$0xff]  ;;  %v195_v63 = vld [vmem:[#allocation8 + $0x128] sm:$0xff]  ;;  %v158_v0 = vld [vmem:[#allocation8] sm:$0xff] }
  0x2a   :  { %282 = vmatpush.msrb.mxu0 %v173_v38  ;;  %304 = vmatpush.msrb.mxu1 %v207_v39  ;;  %v192_v1 = vld [vmem:[#allocation8 + $0x110] sm:$0xff]  ;;  %v159_v2 = vld [vmem:[#allocation8 + $0x8] sm:$0xff]  ;;  %v193_v3 = vld [vmem:[#allocation8 + $0x118] sm:$0xff] }
  0x2b   :  { %237 = vmatpush.msra.mxu2 %v170_v40  ;;  %259 = vmatpush.msra.mxu3 %v204_v41  ;;  %v190_v4 = vld [vmem:[#allocation8 + $0x100] sm:$0xff]  ;;  %v191_v5 = vld [vmem:[#allocation8 + $0x108] sm:$0xff]  ;;  %v88_v6 = vld [vmem:[#allocation7] sm:$0x3] }
  0x2c   :  { %283 = vmatpush.msrb.mxu0 %v171_v42  ;;  %305 = vmatpush.msrb.mxu1 %v205_v43  ;;  %v90_v7 = vperm.slane %v88_v6, 0  ;;  %v91_v8 = vperm.slane %v88_v6, 1  ;;  %v222_v21 = vld [vmem:[%s563_s4] sm:$0x3]  ;;  %s500_s4 = smov [#allocation10]  }
  0x2d   :  { %238 = vmatpush.msra.mxu2 %v168_v44  ;;  %260 = vmatpush.msra.mxu3 %v202_v45  ;;  %v225_v22 = vperm.slane %v222_v21, 1  ;;  %v224_v26 = vperm.slane %v222_v21, 0  ;;  %s332_s15 = sshll.u32 %s500_s4, 4  ;;  %s333_s15 = int_to_ptr.vmem [resolvable:$true] %s332_s15 }
  0x2e   :  { %284 = vmatpush.msrb.mxu0 %v169_v46  ;;  %306 = vmatpush.msrb.mxu1 %v203_v47 }
  0x2f   :  { %239 = vmatpush.msra.mxu2 %v166_v48  ;;  %261 = vmatpush.msra.mxu3 %v200_v49 }
  0x30   :  { %285 = vmatpush.msrb.mxu0 %v167_v50  ;;  %307 = vmatpush.msrb.mxu1 %v201_v51 }
  0x31   :  { %240 = vmatpush.msra.mxu2 %v164_v52  ;;  %262 = vmatpush.msra.mxu3 %v198_v53 }
  0x32   :  { %286 = vmatpush.msrb.mxu0 %v165_v54  ;;  %308 = vmatpush.msrb.mxu1 %v199_v55 }
  0x33   :  { %241 = vmatpush.msra.mxu2 %v162_v56  ;;  %263 = vmatpush.msra.mxu3 %v196_v57 }
  0x34   :  { %287 = vmatpush.msrb.mxu0 %v163_v58  ;;  %309 = vmatpush.msrb.mxu1 %v197_v59 }
  0x35   :  { %242 = vmatpush.msra.mxu2 %v160_v60  ;;  %264 = vmatpush.msra.mxu3 %v194_v61 }
  0x36   :  { %288 = vmatpush.msrb.mxu0 %v161_v62  ;;  %310 = vmatpush.msrb.mxu1 %v195_v63 }
  0x37   :  { %243 = vmatpush.msra.mxu2 %v158_v0  ;;  %265 = vmatpush.msra.mxu3 %v192_v1 }
  0x38   :  { %289 = vmatpush.msrb.mxu0 %v159_v2  ;;  %311 = vmatpush.msrb.mxu1 %v193_v3 }
  0x39   :  { %266 = vmatpush.msra.mxu3 %v190_v4 }
  0x3a   :  { %312 = vmatpush.msrb.mxu1 %v191_v5 }
  0x95   :  { %v125_v9 = vpop.f32.mrf.mxu0 }
  0x96   :  { %v148_v10 = vpop.f32.mrf.mxu1  ;;  %v126_v11 = vadd.f32 %v125_v9, %v90_v7 }
  0x97   :  { %v149_v12 = vadd.f32 %v148_v10, %v91_v8 }
  0x98   :  { %v154_v13 = vmax.f32 %v126_v11, 0.0 }
  0x99   :  { %v155_v14 = vmax.f32 %v149_v12, 0.0 }
  0x9a   :  { %244 = vmatmul.f32.vlgmr.msra.gmra.mxu2 %v154_v13  ;;  %290 = vmatmul.f32.vlgmr.msrb.gmra.mxu0 %v154_v13 }
  0x9b   :  { %267 = vmatmul.f32.vlgmr.msra.gmra.mxu3 %v155_v14  ;;  %313 = vmatmul.f32.vlgmr.msrb.gmra.mxu1 %v155_v14 }
  0x9d   :  { %v128_v15 = vpop.f32.mrf.mxu0 }
  0x9e   :  { %v151_v16 = vpop.f32.mrf.mxu1  ;;  %v129_v17 = vadd.f32 %v128_v15, %v90_v7 }
  0x9f   :  { %v152_v18 = vadd.f32 %v151_v16, %v91_v8 }
  0xa0   :  { %v156_v19 = vmax.f32 %v129_v17, 0.0 }
  0xa1   :  { %v157_v20 = vmax.f32 %v152_v18, 0.0 }
  0xa2   :  { %247 = vmatmul.f32.gmra.mxu2 %v156_v19  ;;  %293 = vmatmul.f32.gmra.mxu0 %v156_v19 }
  0xa3   :  { %270 = vmatmul.f32.gmra.mxu3 %v157_v20  ;;  %316 = vmatmul.f32.gmra.mxu1 %v157_v20 }
 0x117   :  { %v291_v23 = vpop.f32.mrf.mxu0 }
 0x118   :  { %v314_v24 = vpop.f32.mrf.mxu1  ;;  %v292_v25 = vadd.f32 %v291_v23, %v225_v22 }
 0x11a   :  { %v315_v28 = vadd.f32 %v314_v24, %v292_v25 }
 0x11c   :  { %v321_v33 = vmax.f32 %v315_v28, 0.0 }
 0x11d   :  { %v245_v27 = vpop.f32.mrf.mxu2 }
 0x11e   :  { %v246_v29 = vadd.f32 %v245_v27, %v224_v26  ;;  %v268_v30 = vpop.f32.mrf.mxu3 }
 0x11f   :  { %v294_v31 = vpop.f32.mrf.mxu0 }
 0x120   :  { %v269_v32 = vadd.f32 %v268_v30, %v246_v29  ;;  %v295_v35 = vadd.f32 %v294_v31, %v225_v22  ;;  %v317_v36 = vpop.f32.mrf.mxu1 }
 0x122   :  { %v320_v34 = vmax.f32 %v269_v32, 0.0  ;;  %v318_v39 = vadd.f32 %v317_v36, %v295_v35 }
 0x124   :  { %v324_v37 = vpack.c.bf16 %v321_v33, %v320_v34  ;;  %v323_v43 = vmax.f32 %v318_v39, 0.0 }
 0x125   :  { %v248_v38 = vpop.f32.mrf.mxu2 }
 0x126   :  { %326 = vst [vmem:[#allocation10] sm:$0xff] %v324_v37  ;;  %v249_v40 = vadd.f32 %v248_v38, %v224_v26  ;;  %v271_v41 = vpop.f32.mrf.mxu3 }
 0x128   :  { %v272_v42 = vadd.f32 %v271_v41, %v249_v40 }
 0x12a   :  { %v322_v44 = vmax.f32 %v272_v42, 0.0 }
 0x12c   :  { %v325_v45 = vpack.c.bf16 %v323_v43, %v322_v44 }
 0x12e   :  { %327 = vst [vmem:[#allocation10 + $0x8] sm:$0xff] %v325_v45 }
 0x12f   :  { %340 = dma.vmem_to_hbm [thread:$0]  %s333_s15, 256, %s335_s18, [#allocation4], %s496_s30, %s496_s30, %s497_s6  }
 0x130   :  { %490 = dma.done.wait [#allocation4], 256  }
 0x131   :  { %491 = vsyncadd [#allocation4], 4294967040 }
 0x132   :  { %345 = vsyncpa [#allocation3], 1 }
 0x133   :  { %346 = vsyncpa [#allocation6], 1 }
 0x134   :  { %347 = vsyncpa [#allocation9], 1 }
 0x135   :  { %348 = vsyncpa [#allocation4], 1 }

</bundles_post_ra>
